<compile_context>
chip_gen: v6e
topology: v6e:2x2x1
jax: 0.10.0
libtpu: 0.0.40
codegen_flags: <defaults>
</compile_context>

<pallas_src>
import jax
import jax.numpy as jnp
from jax.experimental import pallas as pl
from jax.experimental.pallas import tpu as pltpu


def _round_up(x, m):
    return (x + m - 1) // m * m


def _core_network_kernel(g_ref, h_ref, wg_ref, wh_ref, b_ref, out_ref):
    """One (tb, tn) output tile: relu(g @ Wg + h @ Wh + b), f32 accumulation."""
    cd = wg_ref.dtype                                   # MXU operand dtype
    acc = jnp.dot(g_ref[...].astype(cd), wg_ref[...],
                  preferred_element_type=jnp.float32)
    acc = acc + jnp.dot(h_ref[...].astype(cd), wh_ref[...],
                        preferred_element_type=jnp.float32)
    acc = acc + b_ref[...]                              # (1, tn) f32 bias row
    out_ref[...] = jnp.maximum(acc, 0.0).astype(out_ref.dtype)


def prepare_params(w_i2h, b_i2h, w_h2h, b_h2h, *, compute_dtype=jnp.bfloat16):
    """One-time parameter prep: lane-pad hidden to a 128 multiple, cast weights
    to the MXU compute dtype, pre-sum the two biases in f32.

    w_i2h: (input_size, hidden)   (transposed vs. PyTorch Linear -> x @ W)
    w_h2h: (hidden, hidden)
    """
    _, hidden = w_i2h.shape
    Np = _round_up(hidden, 128)
    wg = jnp.pad(w_i2h, ((0, 0), (0, Np - hidden))).astype(compute_dtype)
    wh = jnp.pad(w_h2h, ((0, 0), (0, Np - hidden))).astype(compute_dtype)
    b = b_i2h.astype(jnp.float32) + b_h2h.astype(jnp.float32)
    b = jnp.pad(b, (0, Np - hidden)).reshape(1, Np)
    return {"wg": wg, "wh": wh, "b": b, "hidden_size": hidden}


def core_network_forward(g_t, h_t_prev, params, *, block_b=256, block_n=2048):
    """Pallas TPU forward: h_t = relu(i2h(g_t) + h2h(h_t_prev)).

    g_t: (B, input_size), h_t_prev: (B, hidden).  `params` from prepare_params.
    Returns h_t: (B, hidden) in g_t.dtype.
    """
    wg, wh, b = params["wg"], params["wh"], params["b"]
    hidden = params["hidden_size"]
    B, input_size = g_t.shape
    H = h_t_prev.shape[1]
    Np = wg.shape[1]

    # ---- balanced batch tiling (multiple-of-8 tiles; no pad when B fits) ----
    block_b = max(8, (block_b // 8) * 8)
    if B <= block_b:
        tb, Bp = B, B
    else:
        n_tiles = -(-B // block_b)                       # cdiv
        tb = _round_up(-(-B // n_tiles), 8)              # balanced tile
        Bp = _round_up(B, tb)
    grid_b = Bp // tb

    # ---- output-column (N) tiling: tn divides Np, multiple of 128 ----
    block_n = max(128, (block_n // 128) * 128)
    units = Np // 128
    tn_units = 1
    for d in range(1, units + 1):
        if units % d == 0 and d * 128 <= block_n:
            tn_units = d
    tn = tn_units * 128
    grid_n = Np // tn

    if Bp > B:   # only when B > block_b and not divisible; bounded < one tile
        g_t = jnp.pad(g_t, ((0, Bp - B), (0, 0)))
        h_t_prev = jnp.pad(h_t_prev, ((0, Bp - B), (0, 0)))

    # Resident (constant-index) weights/bias: single buffer (no wasted VMEM).
    resident = grid_n == 1
    def _wspec(shape, index_map):
        if resident:
            return pl.BlockSpec(shape, index_map, pipeline_mode=pl.Buffered(1))
        return pl.BlockSpec(shape, index_map)

    cd_bytes = jnp.dtype(wg.dtype).itemsize
    act_bytes = g_t.dtype.itemsize
    out_bytes = g_t.dtype.itemsize
    w_bufs = 1 if resident else 2
    vmem_need = (
        w_bufs * (input_size + H) * tn * cd_bytes        # weight tiles
        + w_bufs * tn * 4                                # bias tile (f32)
        + 2 * tb * (input_size + H) * act_bytes          # double-buffered acts
        + 2 * tb * tn * out_bytes                        # double-buffered out
    )
    vmem_limit = int(min(max(2 * vmem_need + (4 << 20), 32 << 20), 64 << 20))

    flops = 2 * Bp * (input_size + H) * Np
    bytes_accessed = (
        Bp * (input_size + H) * act_bytes
        + (input_size + H) * Np * cd_bytes
        + Np * 4
        + Bp * Np * out_bytes
    )

    out = pl.pallas_call(
        _core_network_kernel,
        out_shape=jax.ShapeDtypeStruct((Bp, Np), g_t.dtype),
        grid=(grid_n, grid_b),                 # N outer: weights read once
        in_specs=[
            pl.BlockSpec((tb, input_size), lambda j, i: (i, 0)),   # g tile
            pl.BlockSpec((tb, H), lambda j, i: (i, 0)),            # h tile
            _wspec((input_size, tn), lambda j, i: (0, j)),         # Wg block
            _wspec((H, tn), lambda j, i: (0, j)),                  # Wh block
            _wspec((1, tn), lambda j, i: (0, j)),                  # bias block
        ],
        out_specs=pl.BlockSpec((tb, tn), lambda j, i: (i, j)),
        compiler_params=pltpu.CompilerParams(
            dimension_semantics=("parallel", "parallel"),
            vmem_limit_bytes=vmem_limit,
        ),
        cost_estimate=pl.CostEstimate(
            flops=int(flops), transcendentals=0,
            bytes_accessed=int(bytes_accessed)),
    )(g_t, h_t_prev, wg, wh, b)

    return out[:B, :hidden]


def init_params(key, input_size, hidden_size, dtype=jnp.float32):
    """Deterministic init matching nn.Linear shapes (stored transposed)."""
    k1, k2, k3, k4 = jax.random.split(key, 4)
    bound_i = 1.0 / jnp.sqrt(input_size)
    bound_h = 1.0 / jnp.sqrt(hidden_size)
    w_i2h = jax.random.uniform(k1, (input_size, hidden_size), dtype,
                               minval=-bound_i, maxval=bound_i)
    b_i2h = jax.random.uniform(k2, (hidden_size,), dtype,
                               minval=-bound_i, maxval=bound_i)
    w_h2h = jax.random.uniform(k3, (hidden_size, hidden_size), dtype,
                               minval=-bound_h, maxval=bound_h)
    b_h2h = jax.random.uniform(k4, (hidden_size,), dtype,
                               minval=-bound_h, maxval=bound_h)
    return w_i2h, b_i2h, w_h2h, b_h2h


def _reference(g_t, h_t_prev, w_i2h, b_i2h, w_h2h, b_h2h):
    return jax.nn.relu(g_t @ w_i2h + b_i2h + h_t_prev @ w_h2h + b_h2h)


if __name__ == "__main__":
    key = jax.random.PRNGKey(0)

    # ---- primary small-shape test (module-sized) ---------------------------
    B, input_size, hidden_size = 8, 32, 32
    kg, kh, kp, k2 = jax.random.split(key, 4)
    g_t = jax.random.normal(kg, (B, input_size), jnp.float32)
    h_t_prev = jax.random.normal(kh, (B, hidden_size), jnp.float32)
    w_i2h, b_i2h, w_h2h, b_h2h = init_params(kp, input_size, hidden_size)
    ref = _reference(g_t, h_t_prev, w_i2h, b_i2h, w_h2h, b_h2h)

    # (a) f32 MXU operands: exact check of kernel plumbing vs. reference.
    p_f32 = prepare_params(w_i2h, b_i2h, w_h2h, b_h2h,
                           compute_dtype=jnp.float32)
    h_f32 = jax.block_until_ready(core_network_forward(g_t, h_t_prev, p_f32))
    assert h_f32.shape == (B, hidden_size)
    assert jnp.allclose(h_f32, ref, atol=1e-5, rtol=1e-5)

    # (b) default fast path: bf16 MXU operands, f32 accumulation/epilogue
    #     (small numerics delta vs. the f32 reference -> loosened tolerance).
    p_bf16 = prepare_params(w_i2h, b_i2h, w_h2h, b_h2h)
    h_bf16 = jax.block_until_ready(core_network_forward(g_t, h_t_prev, p_bf16))
    assert h_bf16.shape == (B, hidden_size)
    assert jnp.allclose(h_bf16, ref, atol=5e-2, rtol=5e-2)

    # ---- exercise the multi-batch-tile path (grid_b > 1, batch padding) ----
    B2 = 20
    g2 = jax.random.normal(jax.random.fold_in(k2, 1), (B2, input_size))
    h2 = jax.random.normal(jax.random.fold_in(k2, 2), (B2, hidden_size))
    out2 = jax.block_until_ready(
        core_network_forward(g2, h2, p_f32, block_b=8))
    ref2 = _reference(g2, h2, w_i2h, b_i2h, w_h2h, b_h2h)
    assert out2.shape == (B2, hidden_size)
    assert jnp.allclose(out2, ref2, atol=1e-4, rtol=1e-4)

    # ---- exercise the N-tiled (streamed weight) path (grid_n > 1) ----------
    B3, in3, hid3 = 16, 64, 256
    kg3, kh3, kp3 = jax.random.split(jax.random.fold_in(key, 7), 3)
    g3 = jax.random.normal(kg3, (B3, in3), jnp.float32)
    h3 = jax.random.normal(kh3, (B3, hid3), jnp.float32)
    w3a, b3a, w3b, b3b = init_params(kp3, in3, hid3)
    p3 = prepare_params(w3a, b3a, w3b, b3b, compute_dtype=jnp.float32)
    out3 = jax.block_until_ready(
        core_network_forward(g3, h3, p3, block_n=128))
    ref3 = _reference(g3, h3, w3a, b3a, w3b, b3b)
    assert out3.shape == (B3, hid3)
    assert jnp.allclose(out3, ref3, atol=1e-4, rtol=1e-4)

    print("KERNEL_OK")
</pallas_src>

<mosaic_0001>
module attributes {stable_mosaic.version = 11 : i64} {
  func.func @_core_network_kernel(%arg0: i32, %arg1: i32, %arg2: memref<8x32xf32, #tpu.memory_space<vmem>>, %arg3: memref<8x32xf32, #tpu.memory_space<vmem>>, %arg4: memref<32x128xf32, #tpu.memory_space<vmem>>, %arg5: memref<32x128xf32, #tpu.memory_space<vmem>>, %arg6: memref<1x128xf32, #tpu.memory_space<vmem>>, %arg7: memref<8x128xf32, #tpu.memory_space<vmem>>) attributes {dimension_semantics = [#tpu.dimension_semantics<parallel>, #tpu.dimension_semantics<parallel>], iteration_bounds = array<i64: 1, 1>, scalar_prefetch = 0 : i64, scratch_operands = 0 : i64, tpu.core_type = #tpu.core_type<tc>, window_params = [{transform_indices = @transform_0, window_bounds = array<i64: 8, 32>}, {transform_indices = @transform_1, window_bounds = array<i64: 8, 32>}, {pipeline_mode = #tpu.pipeline_mode<synchronous>, transform_indices = @transform_2, window_bounds = array<i64: 32, 128>}, {pipeline_mode = #tpu.pipeline_mode<synchronous>, transform_indices = @transform_3, window_bounds = array<i64: 32, 128>}, {pipeline_mode = #tpu.pipeline_mode<synchronous>, transform_indices = @transform_4, window_bounds = array<i64: 1, 128>}, {transform_indices = @transform_5, window_bounds = array<i64: 8, 128>}]} {
    %c0 = arith.constant 0 : index
    %c0_0 = arith.constant 0 : index
    %0 = vector.load %arg2[%c0, %c0_0] : memref<8x32xf32, #tpu.memory_space<vmem>>, vector<8x32xf32>
    %c0_1 = arith.constant 0 : index
    %c0_2 = arith.constant 0 : index
    %1 = vector.load %arg4[%c0_1, %c0_2] : memref<32x128xf32, #tpu.memory_space<vmem>>, vector<32x128xf32>
    %cst = arith.constant dense<0.000000e+00> : vector<8x128xf32>
    %2 = tpu.matmul %0, %1, %cst {dimension_numbers = #tpu.dot_dimension_numbers<[1], [0], [0], [1], [0, 0, 1, 1], [], []>} : vector<8x32xf32>, vector<32x128xf32>, vector<8x128xf32> -> vector<8x128xf32>
    %c0_3 = arith.constant 0 : index
    %c0_4 = arith.constant 0 : index
    %3 = vector.load %arg3[%c0_3, %c0_4] : memref<8x32xf32, #tpu.memory_space<vmem>>, vector<8x32xf32>
    %c0_5 = arith.constant 0 : index
    %c0_6 = arith.constant 0 : index
    %4 = vector.load %arg5[%c0_5, %c0_6] : memref<32x128xf32, #tpu.memory_space<vmem>>, vector<32x128xf32>
    %cst_7 = arith.constant dense<0.000000e+00> : vector<8x128xf32>
    %5 = tpu.matmul %3, %4, %cst_7 {dimension_numbers = #tpu.dot_dimension_numbers<[1], [0], [0], [1], [0, 0, 1, 1], [], []>} : vector<8x32xf32>, vector<32x128xf32>, vector<8x128xf32> -> vector<8x128xf32>
    %6 = arith.addf %2, %5 : vector<8x128xf32>
    %c0_8 = arith.constant 0 : index
    %c0_9 = arith.constant 0 : index
    %7 = vector.load %arg6[%c0_8, %c0_9] : memref<1x128xf32, #tpu.memory_space<vmem>>, vector<1x128xf32>
    %8 = vector.broadcast %7 : vector<1x128xf32> to vector<8x128xf32>
    %9 = arith.addf %6, %8 : vector<8x128xf32>
    %cst_10 = arith.constant 0.000000e+00 : f32
    %10 = vector.broadcast %cst_10 : f32 to vector<8x128xf32>
    %11 = arith.maximumf %9, %10 : vector<8x128xf32>
    %c0_11 = arith.constant 0 : index
    %c0_12 = arith.constant 0 : index
    %12 = vector.load %arg7[%c0_11, %c0_12] : memref<8x128xf32, #tpu.memory_space<vmem>>, vector<8x128xf32>
    tpu.vector_store %arg7[%c0_11, %c0_12], %11 {strides = array<i32>} : memref<8x128xf32, #tpu.memory_space<vmem>>, vector<8x128xf32>,
    return
  }
  func.func @transform_0(%arg0: i32, %arg1: i32) -> (i32, i32) {
    %c0_i32 = arith.constant 0 : i32
    %c0_i32_0 = arith.constant 0 : i32
    return %arg1, %c0_i32 : i32, i32
  }
  func.func @transform_1(%arg0: i32, %arg1: i32) -> (i32, i32) {
    %c0_i32 = arith.constant 0 : i32
    %c0_i32_0 = arith.constant 0 : i32
    return %arg1, %c0_i32 : i32, i32
  }
  func.func @transform_2(%arg0: i32, %arg1: i32) -> (i32, i32) {
    %c0_i32 = arith.constant 0 : i32
    %c0_i32_0 = arith.constant 0 : i32
    return %c0_i32, %arg0 : i32, i32
  }
  func.func @transform_3(%arg0: i32, %arg1: i32) -> (i32, i32) {
    %c0_i32 = arith.constant 0 : i32
    %c0_i32_0 = arith.constant 0 : i32
    return %c0_i32, %arg0 : i32, i32
  }
  func.func @transform_4(%arg0: i32, %arg1: i32) -> (i32, i32) {
    %c0_i32 = arith.constant 0 : i32
    %c0_i32_0 = arith.constant 0 : i32
    return %c0_i32, %arg0 : i32, i32
  }
  func.func @transform_5(%arg0: i32, %arg1: i32) -> (i32, i32) {
    %c0_i32 = arith.constant 0 : i32
    return %arg1, %arg0 : i32, i32
  }
}

</mosaic_0001>

<bundles_post_ra>
// kernel: tpu_custom_call.1
= control target key start
LH: loop header
LB: loop body
LE: loop exit
PB: predicated region body
PF: predicated region fallthrough
CT: control target
= control target key end

     0   :  { %10 = vsyncpa [#allocation3], 0  ;;  %s465_s0 = inlined_call_operand.hbm [shape: f32[8,32], index: 0, kind: input, shape index: {}]   ;;  %s466_s1 = inlined_call_operand.hbm [shape: f32[8,32], index: 1, kind: input, shape index: {}]   ;;  %s467_s2 = inlined_call_operand.hbm [shape: f32[32,128], index: 2, kind: input, shape index: {}]   ;;  %s468_s3 = inlined_call_operand.hbm [shape: f32[32,128], index: 3, kind: input, shape index: {}]   ;;  %s469_s4 = inlined_call_operand.vmem [shape: f32[1,128], index: 4, kind: input, shape index: {}]   ;;  %s470_s5 = inlined_call_operand.hbm [shape: f32[8,128], index: 5, kind: output, shape index: {}]  }
   0x1   :  { %11 = vsyncpa [#allocation6], 0 }
   0x2   :  { %12 = vsyncpa [#allocation9], 0 }
   0x3   :  { %13 = vsyncpa [#allocation4], 0  ;;  %s408_s18 = smov [#allocation5]   ;;  %s409_s20 = smov [#allocation2]  }
   0x4   :  { %s30_s19 = sshll.u32 %s408_s18, 4  ;;  %s20_s21 = sshll.u32 %s409_s20, 4  ;;  %s31_s19 = int_to_ptr.vmem [resolvable:$true] %s30_s19  ;;  %s21_s21 = int_to_ptr.vmem [resolvable:$true] %s20_s21 }
   0x5   :  { %s308_s22 = scalar_lea.vmem %s31_s19, 128  ;;  %p313_p1 = scmp.lt.s32.totalorder %s31_s19, %s31_s19 }
   0x6   :  { %p309_p0 = scmp.ne.s32.totalorder %s31_s19, %s308_s22  ;;  %p314_p2 = scmp.lt.s32.totalorder %s308_s22, %s308_s22 }
   0x8   :  { %p315_p3 = por %p314_p2, %p313_p1 }
   0xa   :  { %p316_p4 = pnand %p315_p3, %p309_p0 }
   0xc   :  { %319 = shalt.err (!%p316_p4)
}
   0xd   :  { %33 = dma.hbm_to_vmem [thread:$0]  %s466_s1, 128, %s31_s19, [#allocation6]  }
   0xe   :  { %s328_s25 = scalar_lea.vmem %s21_s21, 128  ;;  %p333_p6 = scmp.lt.s32.totalorder %s21_s21, %s21_s21 }
   0xf   :  { %p329_p5 = scmp.ne.s32.totalorder %s21_s21, %s328_s25  ;;  %p334_p7 = scmp.lt.s32.totalorder %s328_s25, %s328_s25 }
  0x11   :  { %p335_p8 = por %p334_p7, %p333_p6 }
  0x13   :  { %p336_p9 = pnand %p335_p8, %p329_p5 }
  0x15   :  { %339 = shalt.err (!%p336_p9)
}
  0x16   :  { %23 = dma.hbm_to_vmem [thread:$0]  %s465_s0, 128, %s21_s21, [#allocation3]  }
  0x17   :  { %s410_s28 = smov [#allocation7]  }
  0x18   :  { %s39_s29 = sshll.u32 %s410_s28, 4  ;;  %s40_s29 = int_to_ptr.vmem [resolvable:$true] %s39_s29 }
  0x19   :  { %s348_s30 = scalar_lea.vmem %s40_s29, 512  ;;  %p353_p11 = scmp.lt.s32.totalorder %s40_s29, %s40_s29 }
  0x1a   :  { %p349_p10 = scmp.ne.s32.totalorder %s40_s29, %s348_s30  ;;  %p354_p12 = scmp.lt.s32.totalorder %s348_s30, %s348_s30 }
  0x1c   :  { %p355_p13 = por %p354_p12, %p353_p11 }
  0x1e   :  { %p356_p0 = pnand %p355_p13, %p349_p10 }
  0x20   :  { %359 = shalt.err (!%p356_p0)
}
  0x21   :  { %s411_s1 = smov 128   ;;  %s412_s6 = smov 8  }
  0x22   :  { %45 = dma.hbm_to_vmem [thread:$0]  %s467_s2, 512, %s40_s29, [#allocation6], %s411_s1, %s411_s1, %s412_s6  }
  0x23   :  { %s413_s9 = smov [#allocation8]  }
  0x24   :  { %s51_s10 = sshll.u32 %s413_s9, 4  ;;  %s52_s10 = int_to_ptr.vmem [resolvable:$true] %s51_s10 }
  0x25   :  { %s368_s0 = scalar_lea.vmem %s52_s10, 512  ;;  %p373_p2 = scmp.lt.s32.totalorder %s52_s10, %s52_s10 }
  0x26   :  { %p369_p1 = scmp.ne.s32.totalorder %s52_s10, %s368_s0  ;;  %p374_p3 = scmp.lt.s32.totalorder %s368_s0, %s368_s0 }
  0x28   :  { %p375_p4 = por %p374_p3, %p373_p2 }
  0x2a   :  { %p376_p5 = pnand %p375_p4, %p369_p1 }
  0x2c   :  { %379 = shalt.err (!%p376_p5)
}
  0x2d   :  { %57 = dma.hbm_to_vmem [thread:$0]  %s468_s3, 512, %s52_s10, [#allocation9], %s411_s1, %s411_s1, %s412_s6  }
  0x2e   :  { %400 = dma.done.wait [#allocation3], 128  }
  0x2f   :  { %401 = vsyncadd [#allocation3], 4294967168 }
  0x30   :  { %402 = dma.done.wait [#allocation6], 640  }
  0x31   :  { %403 = vsyncadd [#allocation6], 4294966656 }
  0x32   :  { %404 = dma.done.wait [#allocation9], 512  }
  0x33   :  { %405 = vsyncadd [#allocation9], 4294966784  ;;  %v414_v0 = vmov 0.0   ;;  %vm415_vm0 = vmmov 0   ;;  %v81_v1 = vld [vmem:[#allocation8 + $0x18] sm:$0xff]  ;;  %v80_v3 = vld [vmem:[#allocation8 + $0x10] sm:$0xff] }
  0x34   :  { %269 = vmatprep.subr.mxu0 %v414_v0  ;;  %280 = vmatprep.subr.mxu1 %v414_v0  ;;  %v76_v2 = vld [vmem:[#allocation7 + $0x18] sm:$0xff]  ;;  %v75_v4 = vld [vmem:[#allocation7 + $0x10] sm:$0xff]  ;;  %v79_v5 = vld [vmem:[#allocation8 + $0x8] sm:$0xff]  ;;  %vm82_vm1 = vcmask 261120   ;;  %s416_s13 = smov [#allocation10]  }
  0x35   :  { %277 = vmatprep.mubr.msk.f32.mxu0 %vm415_vm0, %v414_v0  ;;  %288 = vmatprep.mubr.msk.f32.mxu1 %vm415_vm0, %v414_v0  ;;  %v74_v6 = vld [vmem:[#allocation7 + $0x8] sm:$0xff]  ;;  %v78_v7 = vld [vmem:[#allocation8] sm:$0xff]  ;;  %v77_v9 = vld [vmem:[#allocation5] sm:$0xff]  ;;  %s245_s14 = sshll.u32 %s416_s13, 4  ;;  %s246_s14 = int_to_ptr.vmem [resolvable:$true] %s245_s14 }
  0x36   :  { %270 = vmatpush3.msra.mxu0 %v81_v1  ;;  %281 = vmatpush3.msra.mxu1 %v76_v2  ;;  %v73_v8 = vld [vmem:[#allocation7] sm:$0xff]  ;;  %v72_v10 = vld [vmem:[#allocation2] sm:$0xff]  ;;  %s380_s15 = scalar_lea.vmem %s246_s14, 128  ;;  %p385_p7 = scmp.lt.s32.totalorder %s246_s14, %s246_s14 }
  0x37   :  { %271 = vmatprep.subr.mxu0 %v414_v0  ;;  %282 = vmatprep.subr.mxu1 %v414_v0  ;;  %v258_v13 = vld [vmem:[%s469_s4] ss:$0 sm:$0xff]  ;;  %p381_p6 = scmp.ne.s32.totalorder %s246_s14, %s380_s15  ;;  %p386_p8 = scmp.lt.s32.totalorder %s380_s15, %s380_s15 }
  0x38   :  { %272 = vmatpush3.msra.mxu0 %v80_v3  ;;  %283 = vmatpush3.msra.mxu1 %v75_v4 }
  0x39   :  { %273 = vmatprep.subr.mxu0 %v414_v0  ;;  %284 = vmatprep.subr.mxu1 %v414_v0  ;;  %p387_p9 = por %p386_p8, %p385_p7 }
  0x3a   :  { %274 = vmatpush3.msra.mxu0 %v79_v5  ;;  %285 = vmatpush3.msra.mxu1 %v74_v6 }
  0x3b   :  { %275 = vmatprep.subr.mxu0 %v414_v0  ;;  %286 = vmatprep.subr.mxu1 %v414_v0  ;;  %p388_p10 = pnand %p387_p9, %p381_p6 }
  0x3c   :  { %276 = vmatpush3.msra.mxu0 %v78_v7  ;;  %287 = vmatpush3.msra.mxu1 %v73_v8 }
  0x3d   :  { %278 = vmatmul.mubr.msk.f32.vlgmr.msra.gmra.mxu0 %vm82_vm1, %v77_v9  ;;  %289 = vmatmul.mubr.msk.f32.vlgmr.msra.gmra.mxu1 %vm82_vm1, %v72_v10 }
  0xfd   :  { %v152_v11 = vpop.f32.mrf.mxu0  ;;  %v225_v12 = vpop.f32.mrf.mxu1 }
  0xfe   :  { %v226_v14 = vadd.f32 %v225_v12, %v152_v11 }
  0xff   :  { %v279_v15 = vpop.f32.mrf.mxu0  ;;  %v290_v16 = vpop.f32.mrf.mxu1 }
 0x100   :  { %v236_v17 = vadd.f32 %v258_v13, %v226_v14 }
 0x102   :  { %v237_v18 = vmax.f32 %v236_v17, 0.0 }
 0x104   :  { %238 = vst [vmem:[#allocation10] sm:$0xff] %v237_v18 }
 0x105   :  { %391 = shalt.err (!%p388_p10)
}
 0x106   :  { %248 = dma.vmem_to_hbm [thread:$0]  %s246_s14, 128, %s470_s5, [#allocation4]  }
 0x107   :  { %406 = dma.done.wait [#allocation4], 128  }
 0x108   :  { %407 = vsyncadd [#allocation4], 4294967168 }
 0x109   :  { %252 = vsyncpa [#allocation3], 1 }
 0x10a   :  { %253 = vsyncpa [#allocation6], 1 }
 0x10b   :  { %254 = vsyncpa [#allocation9], 1 }
 0x10c   :  { %255 = vsyncpa [#allocation4], 1 }

</bundles_post_ra>
